<compile_context>
chip_gen: v7x
topology: tpu7x:2x2x1
jax: 0.10.0
libtpu: 0.0.40
codegen_flags: <defaults>
</compile_context>

<pallas_src>
import numpy as np
import jax
import jax.numpy as jnp
from jax.experimental import pallas as pl
from jax.experimental.pallas import tpu as pltpu

_INV_SQRT2 = 0.7071067811865476
_BN_EPS = 0.001  # nn.BatchNorm1d(z_dim, momentum=0.01, eps=0.001)


def _gelu_exact(x):
    # nn.GELU() default is the exact erf formulation.
    return 0.5 * x * (1.0 + jax.lax.erf(x * _INV_SQRT2))


def _round_up(v, m):
    return (v + m - 1) // m * m


def _default_num_tiles():
    # v7x has 2 TensorCores/chip -> exactly 2 "parallel" N tiles (one per TC).
    # Single-TC chips (v5e/v6e): 1 tile = one DMA, no step overhead, no
    # stage-1 recompute.  Fallback is the safe 1-tile layout.
    try:
        kind = jax.devices()[0].device_kind.lower()
    except Exception:
        return 1
    return 2 if ("v7" in kind or "tpu7" in kind) else 1


# ---------------------------------------------------------------------------
# Fused kernel: grid has 1 (v5e/v6e) or 2 (v7x) steps over N tiles of the
# concatenated, lane-dense head-weight slab.
#   step j:  h = GELU(BN(x @ W1 + b1))        (tiny; recomputed at most twice)
#            out[:, j*tn:(j+1)*tn] = h @ Wh[:, tile j] + bh[tile j]
# BN batch statistics use the full (never grid-tiled) batch axis.
# ---------------------------------------------------------------------------
def fused_decoder_kernel(x_ref, w1_ref, b1_ref, g_ref, be_ref, wh_ref, bh_ref, o_ref):
    # Stage 1: Linear -> BatchNorm1d (training mode) -> exact GELU.
    x = x_ref[...]
    h = jnp.dot(x, w1_ref[...], preferred_element_type=jnp.float32) + b1_ref[...]
    mean = jnp.mean(h, axis=0, keepdims=True)
    var = jnp.mean((h - mean) ** 2, axis=0, keepdims=True)   # biased variance
    hn = (h - mean) * jax.lax.rsqrt(var + _BN_EPS)
    hn = hn * g_ref[...] + be_ref[...]
    hg = _gelu_exact(hn)                                     # stays f32 (accuracy)

    # Stage 2: lane-dense head matmul for this N tile.  Weights stream from
    # HBM as bf16 and are upcast in VMEM (HBM bytes unchanged, precision kept).
    w = wh_ref[...].astype(jnp.float32)
    o_ref[...] = (
        jnp.dot(hg, w, preferred_element_type=jnp.float32) + bh_ref[...]
    ).astype(o_ref.dtype)


# ---------------------------------------------------------------------------
# Parameter preparation (wrapper-side layout plumbing, done once):
#   * pad Z -> Zp (multiple of 128)
#   * concatenate all head weights/biases -> one lane-dense slab,
#     pad N -> Npad (multiple of 128*num_tiles), then tn = Npad // num_tiles
#   * cast the dominant-traffic head-weight slab to bf16
# ---------------------------------------------------------------------------
def prepare_decoder_params(params, *, num_tiles=None, weight_dtype=jnp.bfloat16):
    if num_tiles is None:
        num_tiles = _default_num_tiles()
    num_tiles = max(1, int(num_tiles))

    Z = params["w1"].shape[0]
    Zp = _round_up(Z, 128)
    shapes = [int(w.shape[1]) for (w, _) in params["heads"]]
    n_tot = int(np.sum(shapes))
    # Pad the head dim first, THEN derive the tile size (no padding inflation).
    n_pad = _round_up(n_tot, 128 * num_tiles)
    tn = n_pad // num_tiles

    def pad2(a, rows, cols):
        return jnp.pad(a, ((0, rows - a.shape[0]), (0, cols - a.shape[1])))

    wh = jnp.concatenate([w for (w, _) in params["heads"]], axis=1)
    bh = jnp.concatenate([b for (_, b) in params["heads"]], axis=1)

    return dict(
        w1=pad2(params["w1"], Zp, Zp).astype(jnp.float32),
        b1=pad2(params["b1"], 1, Zp).astype(jnp.float32),
        # gamma/beta MUST stay zero-padded so padded feature columns remain 0.
        gamma=pad2(params["gamma"], 1, Zp).astype(jnp.float32),
        beta=pad2(params["beta"], 1, Zp).astype(jnp.float32),
        wh=pad2(wh, Zp, n_pad).astype(weight_dtype),
        bh=pad2(bh, 1, n_pad).astype(jnp.float32),
        Z=Z, Zp=Zp, tn=tn, Npad=n_pad, num_tiles=num_tiles, shapes=shapes,
    )


def decoder_forward(x, prep):
    B, Z = x.shape
    Zp, tn, n_pad, num_tiles = prep["Zp"], prep["tn"], prep["Npad"], prep["num_tiles"]
    xp = jnp.pad(x.astype(jnp.float32), ((0, 0), (0, Zp - Z)))

    grid = (num_tiles,)

    # Advisory cost hint (stage-1 work scales with the now-tiny grid length).
    w_bytes = int(prep["wh"].size) * prep["wh"].dtype.itemsize
    cost = pl.CostEstimate(
        flops=2 * B * Zp * n_pad + num_tiles * 2 * B * Zp * Zp,
        transcendentals=num_tiles * B * Zp,
        bytes_accessed=w_bytes + Zp * Zp * 4 + B * Zp * 4 + B * n_pad * 4
        + n_pad * 4 + 3 * Zp * 4,
    )

    out = pl.pallas_call(
        fused_decoder_kernel,
        out_shape=jax.ShapeDtypeStruct((B, n_pad), jnp.float32),
        grid_spec=pltpu.PrefetchScalarGridSpec(
            num_scalar_prefetch=0,
            grid=grid,
            in_specs=[
                pl.BlockSpec((B, Zp), lambda j: (0, 0)),     # x      (resident)
                pl.BlockSpec((Zp, Zp), lambda j: (0, 0)),    # W1     (resident)
                pl.BlockSpec((1, Zp), lambda j: (0, 0)),     # b1
                pl.BlockSpec((1, Zp), lambda j: (0, 0)),     # gamma
                pl.BlockSpec((1, Zp), lambda j: (0, 0)),     # beta
                pl.BlockSpec((Zp, tn), lambda j: (0, j)),    # head-W slab, N tile
                pl.BlockSpec((1, tn), lambda j: (0, j)),     # head-b slab, N tile
            ],
            out_specs=pl.BlockSpec((B, tn), lambda j: (0, j)),
        ),
        compiler_params=pltpu.CompilerParams(
            # N tiles are independent -> shards across v7x's 2 TensorCores;
            # with a single tile on v5e/v6e this is a no-op.
            dimension_semantics=("parallel",),
        ),
        cost_estimate=cost,
    )(xp, prep["w1"], prep["b1"], prep["gamma"], prep["beta"], prep["wh"], prep["bh"])

    # Slice the lane-dense slab back into the n per-head outputs (plain XLA).
    outs, start = [], 0
    for n_i in prep["shapes"]:
        outs.append(out[:, start:start + n_i])
        start += n_i
    return outs


# ---------------------------------------------------------------------------
# Pure-JAX f32 reference (mirrors the PyTorch module exactly).
# ---------------------------------------------------------------------------
def decoder_reference(x, params):
    h = x @ params["w1"] + params["b1"]
    mean = jnp.mean(h, axis=0, keepdims=True)
    var = jnp.mean((h - mean) ** 2, axis=0, keepdims=True)
    h = (h - mean) / jnp.sqrt(var + _BN_EPS)
    h = h * params["gamma"] + params["beta"]
    h = 0.5 * h * (1.0 + jax.scipy.special.erf(h * _INV_SQRT2))
    return [h @ wi + bi for (wi, bi) in params["heads"]]


if __name__ == "__main__":
    # Small shapes consistent with the module: batch=8, z_dim=32, n=4 heads.
    B, Z, n = 8, 32, 4
    head_shapes = [48, 64, 96, 33]   # deliberately non-128-multiples

    key = jax.random.PRNGKey(0)
    keys = jax.random.split(key, 3 + 2 * n)

    x = jax.random.normal(keys[0], (B, Z), jnp.float32)

    params = {
        "w1": jax.random.normal(keys[1], (Z, Z), jnp.float32) * 0.1,
        "b1": jax.random.normal(keys[2], (1, Z), jnp.float32) * 0.1,
        # BatchNorm1d affine params at their PyTorch init values.
        "gamma": jnp.ones((1, Z), jnp.float32),
        "beta": jnp.zeros((1, Z), jnp.float32),
        "heads": [
            (
                jax.random.normal(keys[3 + 2 * i], (Z, head_shapes[i]), jnp.float32) * 0.1,
                jax.random.normal(keys[4 + 2 * i], (1, head_shapes[i]), jnp.float32) * 0.1,
            )
            for i in range(n)
        ],
    }

    # num_tiles auto-selects: 1 on v5e/v6e (single weight DMA, no recompute),
    # 2 on v7x (one "parallel" tile per TensorCore).
    prep = prepare_decoder_params(params)

    outs = decoder_forward(x, prep)
    outs = [jax.block_until_ready(o) for o in outs]

    refs = decoder_reference(x, params)
    for o, r in zip(outs, refs):
        assert o.shape == r.shape, (o.shape, r.shape)
        # bf16 head-weight storage (f32 LHS, f32 accumulation) -> tight tolerance.
        assert jnp.allclose(o, r, atol=1e-2, rtol=1e-2), float(jnp.max(jnp.abs(o - r)))

    print("KERNEL_OK")
</pallas_src>

<mosaic_0001>
module attributes {stable_mosaic.version = 11 : i64} {
  func.func @fused_decoder_kernel(%arg0: i32, %arg1: memref<8x128xf32, #tpu.memory_space<vmem>>, %arg2: memref<128x128xf32, #tpu.memory_space<vmem>>, %arg3: memref<1x128xf32, #tpu.memory_space<vmem>>, %arg4: memref<1x128xf32, #tpu.memory_space<vmem>>, %arg5: memref<1x128xf32, #tpu.memory_space<vmem>>, %arg6: memref<128x256xbf16, #tpu.memory_space<vmem>>, %arg7: memref<1x256xf32, #tpu.memory_space<vmem>>, %arg8: memref<8x256xf32, #tpu.memory_space<vmem>>) attributes {dimension_semantics = [#tpu.dimension_semantics<parallel>], iteration_bounds = array<i64: 1>, scalar_prefetch = 0 : i64, scratch_operands = 0 : i64, tpu.core_type = #tpu.core_type<tc>, window_params = [{pipeline_mode = #tpu.pipeline_mode<synchronous>, transform_indices = @transform_0, window_bounds = array<i64: 8, 128>}, {pipeline_mode = #tpu.pipeline_mode<synchronous>, transform_indices = @transform_1, window_bounds = array<i64: 128, 128>}, {pipeline_mode = #tpu.pipeline_mode<synchronous>, transform_indices = @transform_2, window_bounds = array<i64: 1, 128>}, {pipeline_mode = #tpu.pipeline_mode<synchronous>, transform_indices = @transform_3, window_bounds = array<i64: 1, 128>}, {pipeline_mode = #tpu.pipeline_mode<synchronous>, transform_indices = @transform_4, window_bounds = array<i64: 1, 128>}, {transform_indices = @transform_5, window_bounds = array<i64: 128, 256>}, {transform_indices = @transform_6, window_bounds = array<i64: 1, 256>}, {transform_indices = @transform_7, window_bounds = array<i64: 8, 256>}]} {
    %c0 = arith.constant 0 : index
    %c0_0 = arith.constant 0 : index
    %0 = vector.load %arg1[%c0, %c0_0] : memref<8x128xf32, #tpu.memory_space<vmem>>, vector<8x128xf32>
    %c0_1 = arith.constant 0 : index
    %c0_2 = arith.constant 0 : index
    %1 = vector.load %arg2[%c0_1, %c0_2] : memref<128x128xf32, #tpu.memory_space<vmem>>, vector<128x128xf32>
    %cst = arith.constant dense<0.000000e+00> : vector<8x128xf32>
    %2 = tpu.matmul %0, %1, %cst {dimension_numbers = #tpu.dot_dimension_numbers<[1], [0], [0], [1], [0, 0, 1, 1], [], []>} : vector<8x128xf32>, vector<128x128xf32>, vector<8x128xf32> -> vector<8x128xf32>
    %c0_3 = arith.constant 0 : index
    %c0_4 = arith.constant 0 : index
    %3 = vector.load %arg3[%c0_3, %c0_4] : memref<1x128xf32, #tpu.memory_space<vmem>>, vector<1x128xf32>
    %4 = vector.broadcast %3 : vector<1x128xf32> to vector<8x128xf32>
    %5 = arith.addf %2, %4 : vector<8x128xf32>
    %cst_5 = arith.constant dense<0.000000e+00> : vector<128xf32>
    %6 = vector.multi_reduction <add>, %5, %cst_5 [0] : vector<8x128xf32> to vector<128xf32>
    %7 = vector.shape_cast %6 : vector<128xf32> to vector<1x128xf32>
    %cst_6 = arith.constant 8.000000e+00 : f32
    %8 = vector.broadcast %cst_6 : f32 to vector<1x128xf32>
    %9 = arith.divf %7, %8 : vector<1x128xf32>
    %10 = vector.broadcast %9 : vector<1x128xf32> to vector<8x128xf32>
    %11 = arith.subf %5, %10 : vector<8x128xf32>
    %12 = arith.mulf %11, %11 : vector<8x128xf32>
    %cst_7 = arith.constant dense<0.000000e+00> : vector<128xf32>
    %13 = vector.multi_reduction <add>, %12, %cst_7 [0] : vector<8x128xf32> to vector<128xf32>
    %14 = vector.shape_cast %13 : vector<128xf32> to vector<1x128xf32>
    %cst_8 = arith.constant 8.000000e+00 : f32
    %15 = vector.broadcast %cst_8 : f32 to vector<1x128xf32>
    %16 = arith.divf %14, %15 : vector<1x128xf32>
    %17 = vector.broadcast %9 : vector<1x128xf32> to vector<8x128xf32>
    %18 = arith.subf %5, %17 : vector<8x128xf32>
    %cst_9 = arith.constant 1.000000e-03 : f32
    %19 = vector.broadcast %cst_9 : f32 to vector<1x128xf32>
    %20 = arith.addf %16, %19 : vector<1x128xf32>
    %21 = math.rsqrt %20 : vector<1x128xf32>
    %22 = vector.broadcast %21 : vector<1x128xf32> to vector<8x128xf32>
    %23 = arith.mulf %18, %22 : vector<8x128xf32>
    %c0_10 = arith.constant 0 : index
    %c0_11 = arith.constant 0 : index
    %24 = vector.load %arg4[%c0_10, %c0_11] : memref<1x128xf32, #tpu.memory_space<vmem>>, vector<1x128xf32>
    %25 = vector.broadcast %24 : vector<1x128xf32> to vector<8x128xf32>
    %26 = arith.mulf %23, %25 : vector<8x128xf32>
    %c0_12 = arith.constant 0 : index
    %c0_13 = arith.constant 0 : index
    %27 = vector.load %arg5[%c0_12, %c0_13] : memref<1x128xf32, #tpu.memory_space<vmem>>, vector<1x128xf32>
    %28 = vector.broadcast %27 : vector<1x128xf32> to vector<8x128xf32>
    %29 = arith.addf %26, %28 : vector<8x128xf32>
    %cst_14 = arith.constant 5.000000e-01 : f32
    %30 = vector.broadcast %cst_14 : f32 to vector<8x128xf32>
    %31 = arith.mulf %30, %29 : vector<8x128xf32>
    %cst_15 = arith.constant 0.707106769 : f32
    %32 = vector.broadcast %cst_15 : f32 to vector<8x128xf32>
    %33 = arith.mulf %29, %32 : vector<8x128xf32>
    %34 = math.erf %33 : vector<8x128xf32>
    %cst_16 = arith.constant 1.000000e+00 : f32
    %35 = vector.broadcast %cst_16 : f32 to vector<8x128xf32>
    %36 = arith.addf %35, %34 : vector<8x128xf32>
    %37 = arith.mulf %31, %36 : vector<8x128xf32>
    %c0_17 = arith.constant 0 : index
    %c0_18 = arith.constant 0 : index
    %38 = vector.load %arg6[%c0_17, %c0_18] : memref<128x256xbf16, #tpu.memory_space<vmem>>, vector<128x256xbf16>
    %39 = arith.extf %38 : vector<128x256xbf16> to vector<128x256xf32>
    %cst_19 = arith.constant dense<0.000000e+00> : vector<8x256xf32>
    %40 = tpu.matmul %37, %39, %cst_19 {dimension_numbers = #tpu.dot_dimension_numbers<[1], [0], [0], [1], [0, 0, 1, 1], [], []>} : vector<8x128xf32>, vector<128x256xf32>, vector<8x256xf32> -> vector<8x256xf32>
    %c0_20 = arith.constant 0 : index
    %c0_21 = arith.constant 0 : index
    %41 = vector.load %arg7[%c0_20, %c0_21] : memref<1x256xf32, #tpu.memory_space<vmem>>, vector<1x256xf32>
    %42 = vector.broadcast %41 : vector<1x256xf32> to vector<8x256xf32>
    %43 = arith.addf %40, %42 : vector<8x256xf32>
    %c0_22 = arith.constant 0 : index
    %c0_23 = arith.constant 0 : index
    %44 = vector.load %arg8[%c0_22, %c0_23] : memref<8x256xf32, #tpu.memory_space<vmem>>, vector<8x256xf32>
    tpu.vector_store %arg8[%c0_22, %c0_23], %43 {strides = array<i32>} : memref<8x256xf32, #tpu.memory_space<vmem>>, vector<8x256xf32>,
    return
  }
  func.func @transform_0(%arg0: i32) -> (i32, i32) {
    %c0_i32 = arith.constant 0 : i32
    %c0_i32_0 = arith.constant 0 : i32
    %c0_i32_1 = arith.constant 0 : i32
    return %c0_i32, %c0_i32_0 : i32, i32
  }
  func.func @transform_1(%arg0: i32) -> (i32, i32) {
    %c0_i32 = arith.constant 0 : i32
    %c0_i32_0 = arith.constant 0 : i32
    %c0_i32_1 = arith.constant 0 : i32
    return %c0_i32, %c0_i32_0 : i32, i32
  }
  func.func @transform_2(%arg0: i32) -> (i32, i32) {
    %c0_i32 = arith.constant 0 : i32
    %c0_i32_0 = arith.constant 0 : i32
    %c0_i32_1 = arith.constant 0 : i32
    return %c0_i32, %c0_i32_0 : i32, i32
  }
  func.func @transform_3(%arg0: i32) -> (i32, i32) {
    %c0_i32 = arith.constant 0 : i32
    %c0_i32_0 = arith.constant 0 : i32
    %c0_i32_1 = arith.constant 0 : i32
    return %c0_i32, %c0_i32_0 : i32, i32
  }
  func.func @transform_4(%arg0: i32) -> (i32, i32) {
    %c0_i32 = arith.constant 0 : i32
    %c0_i32_0 = arith.constant 0 : i32
    %c0_i32_1 = arith.constant 0 : i32
    return %c0_i32, %c0_i32_0 : i32, i32
  }
  func.func @transform_5(%arg0: i32) -> (i32, i32) {
    %c0_i32 = arith.constant 0 : i32
    %c0_i32_0 = arith.constant 0 : i32
    return %c0_i32, %arg0 : i32, i32
  }
  func.func @transform_6(%arg0: i32) -> (i32, i32) {
    %c0_i32 = arith.constant 0 : i32
    %c0_i32_0 = arith.constant 0 : i32
    return %c0_i32, %arg0 : i32, i32
  }
  func.func @transform_7(%arg0: i32) -> (i32, i32) {
    %c0_i32 = arith.constant 0 : i32
    %c0_i32_0 = arith.constant 0 : i32
    return %c0_i32, %arg0 : i32, i32
  }
}

</mosaic_0001>

<bundles_post_ra>
// kernel: tpu_custom_call.1
= control target key start
LH: loop header
LB: loop body
LE: loop exit
PB: predicated region body
PF: predicated region fallthrough
CT: control target
= control target key end

     0   :  { %12 = vsyncpa [#allocation3], 0  ;;  %s723_s0 = inlined_call_operand.hbm [shape: f32[8,128], index: 0, kind: input, shape index: {}]   ;;  %s724_s1 = inlined_call_operand.hbm [shape: f32[128,128], index: 1, kind: input, shape index: {}]   ;;  %s725_s2 = inlined_call_operand.vmem [shape: f32[1,128], index: 2, kind: input, shape index: {}]   ;;  %s726_s3 = inlined_call_operand.vmem [shape: f32[1,128], index: 3, kind: input, shape index: {}]   ;;  %s727_s4 = inlined_call_operand.vmem [shape: f32[1,128], index: 4, kind: input, shape index: {}]   ;;  %s728_s5 = inlined_call_operand.hbm [shape: bf16[128,256], index: 5, kind: input, shape index: {}]   ;;  %s729_s6 = inlined_call_operand.vmem [shape: f32[1,256], index: 6, kind: input, shape index: {}]   ;;  %s730_s7 = inlined_call_operand.hbm [shape: f32[8,256], index: 7, kind: output, shape index: {}]  }
   0x1   :  { %13 = vsyncpa [#allocation6], 0 }
   0x2   :  { %14 = vsyncpa [#allocation4], 0  ;;  %s608_s24 = smov [#allocation5]   ;;  %s514_s28 = scalar_lea.hbm %s724_s1, 2048 }
   0x3   :  { %s30_s25 = sshll.u32 %s608_s24, 4  ;;  %p515_p0 = scmp.ne.s32.totalorder %s724_s1, %s514_s28  ;;  %s31_s25 = int_to_ptr.vmem [resolvable:$true] %s30_s25 }
   0x4   :  { %p518_p1 = scmp.lt.u32.totalorder %s514_s28, %s724_s1 }
   0x6   :  { %p520_p2 = pnand %p518_p1, %p515_p0 }
   0x8   :  { %523 = shalt.err (!%p520_p2)
}
   0x9   :  { %s524_s10 = scalar_lea.vmem %s31_s25, 2048  ;;  %p529_p4 = scmp.lt.s32.totalorder %s31_s25, %s31_s25 }
   0xa   :  { %p525_p3 = scmp.ne.s32.totalorder %s31_s25, %s524_s10  ;;  %p530_p5 = scmp.lt.s32.totalorder %s524_s10, %s524_s10 }
   0xc   :  { %p531_p6 = por %p530_p5, %p529_p4 }
   0xe   :  { %p532_p7 = pnand %p531_p6, %p525_p3 }
  0x10   :  { %535 = shalt.err (!%p532_p7)
}
  0x11   :  { %s609_s11 = smov 128   ;;  %s610_s12 = smov 8  }
  0x12   :  { %36 = dma.hbm_to_vmem [thread:$0]  %s724_s1, 2048, %s31_s25, [#allocation6], %s609_s11, %s609_s11, %s610_s12  }
  0x13   :  { %s611_s15 = smov [#allocation2]   ;;  %s612_s17 = smov [#allocation7]  }
  0x14   :  { %s21_s16 = sshll.u32 %s611_s15, 4  ;;  %s48_s18 = sshll.u32 %s612_s17, 4  ;;  %s22_s16 = int_to_ptr.vmem [resolvable:$true] %s21_s16  ;;  %s49_s18 = int_to_ptr.vmem [resolvable:$true] %s48_s18 }
  0x15   :  { %s536_s21 = scalar_lea.hbm %s723_s0, 128 }
  0x16   :  { %p537_p8 = scmp.ne.s32.totalorder %s723_s0, %s536_s21  ;;  %p540_p9 = scmp.lt.u32.totalorder %s536_s21, %s723_s0 }
  0x18   :  { %p542_p10 = pnand %p540_p9, %p537_p8 }
  0x1a   :  { %545 = shalt.err (!%p542_p10)
}
  0x1b   :  { %s546_s1 = scalar_lea.vmem %s22_s16, 128  ;;  %p551_p12 = scmp.lt.s32.totalorder %s22_s16, %s22_s16 }
  0x1c   :  { %p547_p11 = scmp.ne.s32.totalorder %s22_s16, %s546_s1  ;;  %p552_p13 = scmp.lt.s32.totalorder %s546_s1, %s546_s1 }
  0x1e   :  { %p553_p0 = por %p552_p13, %p551_p12 }
  0x20   :  { %p554_p1 = pnand %p553_p0, %p547_p11 }
  0x22   :  { %557 = shalt.err (!%p554_p1)
}
  0x23   :  { %24 = dma.hbm_to_vmem [thread:$0]  %s723_s0, 128, %s22_s16, [#allocation3]  }
  0x24   :  { %s558_s30 = scalar_lea.hbm %s728_s5, 2048 }
  0x25   :  { %p559_p2 = scmp.ne.s32.totalorder %s728_s5, %s558_s30  ;;  %p562_p3 = scmp.lt.u32.totalorder %s558_s30, %s728_s5 }
  0x27   :  { %p564_p4 = pnand %p562_p3, %p559_p2 }
  0x29   :  { %567 = shalt.err (!%p564_p4)
}
  0x2a   :  { %s568_s14 = scalar_lea.vmem %s49_s18, 2048  ;;  %p573_p6 = scmp.lt.s32.totalorder %s49_s18, %s49_s18 }
  0x2b   :  { %p569_p5 = scmp.ne.s32.totalorder %s49_s18, %s568_s14  ;;  %p574_p7 = scmp.lt.s32.totalorder %s568_s14, %s568_s14 }
  0x2d   :  { %p575_p8 = por %p574_p7, %p573_p6 }
  0x2f   :  { %p576_p9 = pnand %p575_p8, %p569_p5 }
  0x31   :  { %579 = shalt.err (!%p576_p9)
}
  0x32   :  { %54 = dma.hbm_to_vmem [thread:$0]  %s728_s5, 2048, %s49_s18, [#allocation6], %s609_s11, %s609_s11, %s610_s12  }
  0x33   :  { %602 = dma.done.wait [#allocation3], 128  }
  0x34   :  { %603 = vsyncadd [#allocation3], 4294967168 }
  0x35   :  { %604 = dma.done.wait [#allocation6], 4096  }
  0x36   :  { %605 = vsyncadd [#allocation6], 4294963200  ;;  %v613_v0 = vmov 0.0|0.0   ;;  %vm614_vm0 = vmmov 0   ;;  %v615_v1 = vmov 0.0   ;;  %v67_v2 = vld [vmem:[#allocation5] sm:$0xff] }
  0x37   :  { %405 = vmatprep.subr.bf16.mxu0 %v613_v0  ;;  %402 = vmatprep.mubr.msk.f32.mxu0 %vm614_vm0, %v615_v1  ;;  %v68_v3 = vld [vmem:[#allocation5 + $0x8] sm:$0xff]  ;;  %v69_v4 = vld [vmem:[#allocation5 + $0x10] sm:$0xff]  ;;  %v70_v6 = vld [vmem:[#allocation5 + $0x18] sm:$0xff] }
  0x38   :  { %325 = vmatprep.mubr.f32.mxu1 %v615_v1  ;;  %v406_v5 = vpack.c.bf16 %v68_v3, %v67_v2  ;;  %v409_v7 = vpack.c.bf16 %v70_v6, %v69_v4  ;;  %v71_v8 = vld [vmem:[#allocation5 + $0x20] sm:$0xff]  ;;  %v72_v9 = vld [vmem:[#allocation5 + $0x28] sm:$0xff]  ;;  %v73_v10 = vld [vmem:[#allocation5 + $0x30] sm:$0xff] }
  0x39   :  { %v74_v11 = vld [vmem:[#allocation5 + $0x38] sm:$0xff]  ;;  %v412_v12 = vpack.c.bf16 %v72_v9, %v71_v8  ;;  %v75_v14 = vld [vmem:[#allocation5 + $0x40] sm:$0xff]  ;;  %v76_v15 = vld [vmem:[#allocation5 + $0x48] sm:$0xff] }
  0x3a   :  { %407 = vmatpush3.bf16.msra.mxu0 %v406_v5  ;;  %v415_v13 = vpack.c.bf16 %v74_v11, %v73_v10  ;;  %v418_v16 = vpack.c.bf16 %v76_v15, %v75_v14  ;;  %v77_v17 = vld [vmem:[#allocation5 + $0x50] sm:$0xff]  ;;  %v78_v18 = vld [vmem:[#allocation5 + $0x58] sm:$0xff]  ;;  %v79_v20 = vld [vmem:[#allocation5 + $0x60] sm:$0xff]  ;;  %v251_v11 = vlaneseq }
  0x3b   :  { %408 = vmatprep.subr.bf16.mxu0 %v613_v0  ;;  %v421_v19 = vpack.c.bf16 %v78_v18, %v77_v17  ;;  %v80_v21 = vld [vmem:[#allocation5 + $0x68] sm:$0xff]  ;;  %v81_v23 = vld [vmem:[#allocation5 + $0x70] sm:$0xff]  ;;  %v82_v24 = vld [vmem:[#allocation5 + $0x78] sm:$0xff] }
  0x3c   :  { %v424_v22 = vpack.c.bf16 %v80_v21, %v79_v20  ;;  %v427_v25 = vpack.c.bf16 %v82_v24, %v81_v23  ;;  %v66_v26 = vld [vmem:[#allocation2] sm:$0xff]  ;;  %v486_v27 = vld [vmem:[#allocation7 + $0x4] ss:$8 sps:$4 sm:$0xff]   ;;  %v488_v28 = vld [vmem:[#allocation7] ss:$8 sps:$4 sm:$0xff]  }
  0x3d   :  { %430 = vmatprep.subr.bf16.mxu1 %v486_v27  ;;  %v489_v29 = vld [vmem:[#allocation7 + $0x14] ss:$8 sps:$4 sm:$0xff]   ;;  %v491_v30 = vld [vmem:[#allocation7 + $0x10] ss:$8 sps:$4 sm:$0xff]   ;;  %v492_v31 = vld [vmem:[#allocation7 + $0x24] ss:$8 sps:$4 sm:$0xff]  }
  0x3e   :  { %410 = vmatpush3.bf16.msra.mxu0 %v409_v7  ;;  %432 = vmatpush1.bf16.msra.mxu1 %v488_v28  ;;  %v494_v32 = vld [vmem:[#allocation7 + $0x20] ss:$8 sps:$4 sm:$0xff]   ;;  %v495_v33 = vld [vmem:[#allocation7 + $0x34] ss:$8 sps:$4 sm:$0xff]   ;;  %v497_v34 = vld [vmem:[#allocation7 + $0x30] ss:$8 sps:$4 sm:$0xff]  }
  0x3f   :  { %411 = vmatprep.subr.bf16.mxu0 %v613_v0  ;;  %434 = vmatprep.subr.bf16.mxu1 %v489_v29  ;;  %v498_v35 = vld [vmem:[#allocation7 + $0x44] ss:$8 sps:$4 sm:$0xff]   ;;  %v500_v36 = vld [vmem:[#allocation7 + $0x40] ss:$8 sps:$4 sm:$0xff]   ;;  %v501_v37 = vld [vmem:[#allocation7 + $0x54] ss:$8 sps:$4 sm:$0xff]  }
  0x40   :  { %v503_v38 = vld [vmem:[#allocation7 + $0x50] ss:$8 sps:$4 sm:$0xff]   ;;  %v504_v39 = vld [vmem:[#allocation7 + $0x64] ss:$8 sps:$4 sm:$0xff]   ;;  %v506_v40 = vld [vmem:[#allocation7 + $0x60] ss:$8 sps:$4 sm:$0xff]  }
  0x41   :  { %v507_v41 = vld [vmem:[#allocation7 + $0x74] ss:$8 sps:$4 sm:$0xff]   ;;  %v509_v42 = vld [vmem:[#allocation7 + $0x70] ss:$8 sps:$4 sm:$0xff]  }
  0x42   :  { %413 = vmatpush3.bf16.msra.mxu0 %v412_v12  ;;  %436 = vmatpush1.bf16.msra.mxu1 %v491_v30  ;;  %v350_v43 = vld [vmem:[%s725_s2] ss:$0 sm:$0xff]  ;;  %v252_v12 = vshrl.u32 %v251_v11, 7 }
  0x43   :  { %414 = vmatprep.subr.bf16.mxu0 %v613_v0  ;;  %438 = vmatprep.subr.bf16.mxu1 %v492_v31  ;;  %v351_v1 = vld [vmem:[%s726_s3] ss:$0 sm:$0xff]  ;;  %s616_s3 = smov [#allocation8]  }
  0x44   :  { %v352_v3 = vld [vmem:[%s727_s4] ss:$0 sm:$0xff]  ;;  %v257_v15 = vsub.s32 1, %v252_v12  ;;  %s340_s4 = sshll.u32 %s616_s3, 4  ;;  %s341_s4 = int_to_ptr.vmem [resolvable:$true] %s340_s4 }
  0x45   :  { %v249_v14 = vld [vmem:[%s729_s6] sm:$0x3]  ;;  %s580_s20 = scalar_lea.vmem %s341_s4, 256  ;;  %p585_p11 = scmp.lt.s32.totalorder %s341_s4, %s341_s4 }
  0x46   :  { %416 = vmatpush3.bf16.msra.mxu0 %v415_v13  ;;  %440 = vmatpush1.bf16.msra.mxu1 %v494_v32  ;;  %v253_v13 = vsub.s32 0, %v252_v12  ;;  %v258_v17 = vrot.slane %v249_v14, %v257_v15  ;;  %p581_p10 = scmp.ne.s32.totalorder %s341_s4, %s580_s20  ;;  %p586_p12 = scmp.lt.s32.totalorder %s580_s20, %s580_s20 }
  0x47   :  { %417 = vmatprep.subr.bf16.mxu0 %v613_v0  ;;  %442 = vmatprep.subr.bf16.mxu1 %v495_v33 }
  0x48   :  { %p587_p13 = por %p586_p12, %p585_p11 }
  0x4a   :  { %419 = vmatpush3.bf16.msra.mxu0 %v418_v16  ;;  %444 = vmatpush1.bf16.msra.mxu1 %v497_v34  ;;  %v254_v16 = vrot.slane %v249_v14, %v253_v13  ;;  %p588_p0 = pnand %p587_p13, %p581_p10 }
  0x4b   :  { %420 = vmatprep.subr.bf16.mxu0 %v613_v0  ;;  %446 = vmatprep.subr.bf16.mxu1 %v498_v35 }
  0x4e   :  { %422 = vmatpush3.bf16.msra.mxu0 %v421_v19  ;;  %448 = vmatpush1.bf16.msra.mxu1 %v500_v36 }
  0x4f   :  { %423 = vmatprep.subr.bf16.mxu0 %v613_v0  ;;  %450 = vmatprep.subr.bf16.mxu1 %v501_v37 }
  0x52   :  { %425 = vmatpush3.bf16.msra.mxu0 %v424_v22  ;;  %452 = vmatpush1.bf16.msra.mxu1 %v503_v38 }
  0x53   :  { %426 = vmatprep.subr.bf16.mxu0 %v613_v0  ;;  %454 = vmatprep.subr.bf16.mxu1 %v504_v39 }
  0x56   :  { %428 = vmatpush3.bf16.msra.mxu0 %v427_v25  ;;  %456 = vmatpush1.bf16.msra.mxu1 %v506_v40 }
  0x57   :  { %458 = vmatprep.subr.bf16.mxu1 %v507_v41 }
  0x59   :  { %403 = vmatmul.mubr.f32.vlgmr.msra.gmra.mrb[0].mxu0 %v66_v26 }
  0x5a   :  { %460 = vmatpush1.bf16.msra.mxu1 %v509_v42 }
 0x12c   :  { %v156_v44 = vpop.f32.mrb[0].mxu0 }
 0x12d   :  { %v157_v45 = vadd.f32 %v350_v43, %v156_v44  ;;  %v404_v46 = vpop.f32.mrb[1].mxu0 }
 0x12f   :  { %v160_v47 = vrot.slane %v157_v45, 4 }
 0x131   :  { %v161_v48 = vadd.f32 %v160_v47, %v157_v45 }
 0x133   :  { %v162_v49 = vrot.slane %v161_v48, 2 }
 0x135   :  { %v163_v50 = vadd.f32 %v162_v49, %v161_v48 }
 0x137   :  { %v164_v51 = vrot.slane %v163_v50, 1 }
 0x139   :  { %v165_v52 = vadd.f32 %v164_v51, %v163_v50 }
 0x13b   :  { %v167_v53 = vmul.f32 0.125, %v165_v52 }
 0x13d   :  { %v168_v54 = vsub.f32 %v157_v45, %v167_v53 }
 0x13f   :  { %v169_v55 = vmul.f32 %v168_v54, %v168_v54 }
 0x141   :  { %v170_v56 = vrot.slane %v169_v55, 4 }
 0x143   :  { %v171_v57 = vadd.f32 %v170_v56, %v169_v55 }
 0x145   :  { %v172_v58 = vrot.slane %v171_v57, 2 }
 0x147   :  { %v173_v59 = vadd.f32 %v172_v58, %v171_v57 }
 0x149   :  { %v174_v60 = vrot.slane %v173_v59, 1 }
 0x14b   :  { %v175_v61 = vadd.f32 %v174_v60, %v173_v59 }
 0x14d   :  { %v176_v62 = vmul.f32 0.125, %v175_v61 }
 0x14f   :  { %v177_v63 = vadd.f32 0.001, %v176_v62 }
 0x151   :  { %510 = vrsqrt.f32 %v177_v63 }
 0x15b   :  { %v511_v0 = vpop.eup %510 }
 0x15c   :  { %v179_v2 = vmul.f32 %v511_v0, %v168_v54 }
 0x15e   :  { %v187_v4 = vmul.f32 %v351_v1, %v179_v2 }
 0x160   :  { %v195_v5 = vadd.f32 %v352_v3, %v187_v4 }
 0x162   :  { %v197_v6 = vmul.f32 0.70710677, %v195_v5  ;;  %v196_v8 = vmul.f32 0.5, %v195_v5 }
 0x164   :  { %512 = verf.f32 %v197_v6 }
 0x16e   :  { %v513_v7 = vpop.eup %512 }
 0x16f   :  { %v199_v9 = vadd.f32 1.0, %v513_v7 }
 0x171   :  { %v200_v10 = vmul.f32 %v199_v9, %v196_v8 }
 0x173   :  { %326 = vmatmul.mubr.f32.vlgmr.msra.gmra.mrb[0].mxu1 %v200_v10 }
 0x246   :  { %v327_v18 = vpop.f32.mrb[0].mxu1 }
 0x247   :  { %v328_v19 = vadd.f32 %v327_v18, %v254_v16  ;;  %v329_v20 = vpop.f32.mrb[1].mxu1 }
 0x248   :  { %v330_v21 = vadd.f32 %v329_v20, %v258_v17 }
 0x249   :  { %332 = vst [vmem:[#allocation8] sm:$0xff] %v328_v19 }
 0x24a   :  { %333 = vst [vmem:[#allocation8 + $0x8] sm:$0xff] %v330_v21 }
 0x24b   :  { %591 = shalt.err (!%p588_p0)
}
 0x24c   :  { %s592_s22 = scalar_lea.hbm %s730_s7, 256 }
 0x24d   :  { %p593_p1 = scmp.ne.s32.totalorder %s730_s7, %s592_s22  ;;  %p596_p2 = scmp.lt.u32.totalorder %s592_s22, %s730_s7 }
 0x24f   :  { %p598_p3 = pnand %p596_p2, %p593_p1 }
 0x251   :  { %601 = shalt.err (!%p598_p3)
}
 0x252   :  { %343 = dma.vmem_to_hbm [thread:$0]  %s341_s4, 256, %s730_s7, [#allocation4]  }
 0x253   :  { %606 = dma.done.wait [#allocation4], 256  }
 0x254   :  { %607 = vsyncadd [#allocation4], 4294967040 }
 0x255   :  { %347 = vsyncpa [#allocation3], 1 }
 0x256   :  { %348 = vsyncpa [#allocation6], 1 }
 0x257   :  { %349 = vsyncpa [#allocation4], 1 }

</bundles_post_ra>
